<compile_context>
chip_gen: v7x
topology: tpu7x:2x2x1
jax: 0.10.0
libtpu: 0.0.40
codegen_flags: <defaults>
</compile_context>

<pallas_src>
import functools

import jax
import jax.numpy as jnp
from jax.experimental import pallas as pl
from jax.experimental.pallas import tpu as pltpu

HIDDEN = 64   # fixed by the module: Linear(nf,64) -> Linear(64,64) -> Linear(64,1)
LANE = 128    # TPU lane width
HP = 128      # hidden dim padded to a full vreg lane width


def _round_up(n, m):
    return (n + m - 1) // m * m


def _mlp_kernel(x_ref, w1_ref, b1_ref, w2_ref, b2_ref, w3_ref, b3_ref, o_ref):
    """Fused 3-layer MLP: relu(relu(x@W1+b1)@W2+b2) . w3 + b3 (lane-dense out)."""
    x = x_ref[...]                                    # (bt, Fp), compute dtype
    h1 = jnp.dot(x, w1_ref[...], preferred_element_type=jnp.float32) + b1_ref[...]
    h1 = jnp.maximum(h1, 0.0).astype(w2_ref.dtype)
    h2 = jnp.dot(h1, w2_ref[...], preferred_element_type=jnp.float32) + b2_ref[...]
    h2 = jnp.maximum(h2, 0.0)                         # (bt, Hp) f32
    # Final Linear(64, 1) as a lane reduction instead of an N=1 MXU pass:
    # avoids a [bt, 1] masked store; output block is lane-dense [1, bt].
    w3_row = w3_ref[...].astype(jnp.float32)          # (1, Hp)
    y = jnp.sum(h2 * w3_row, axis=-1) + b3_ref[0]     # (bt,)
    o_ref[...] = y[None, :].astype(o_ref.dtype)       # (1, bt) lane-dense store


@functools.partial(jax.jit, static_argnames=("batch_tile", "compute_dtype"))
def bcc_mlp_forward(x, params, *, batch_tile=1024, compute_dtype=jnp.bfloat16):
    """Runs BCCMLP.forward.  x: [B, num_features] float32 -> [B, 1] float32."""
    w1, b1, w2, b2, w3, b3 = params
    B, F = x.shape
    Fp = _round_up(F, LANE)
    Hp = HP

    # Big batch tile (multiple of 128) capped by the rounded-up batch size.
    bt = min(_round_up(batch_tile, LANE), _round_up(B, LANE))
    B_pad = _round_up(B, bt)
    num_tiles = B_pad // bt

    # Zero-pad to lane-friendly shapes (exact zeros -> numerically identical).
    xp = jnp.pad(x.astype(compute_dtype), ((0, B_pad - B), (0, Fp - F)))
    w1p = jnp.pad(w1.astype(compute_dtype), ((0, Fp - F), (0, Hp - HIDDEN)))
    w2p = jnp.pad(w2.astype(compute_dtype), ((0, Hp - HIDDEN), (0, Hp - HIDDEN)))
    w3p = jnp.pad(w3.reshape(1, HIDDEN).astype(compute_dtype), ((0, 0), (0, Hp - HIDDEN)))
    b1p = jnp.pad(b1.reshape(1, HIDDEN).astype(jnp.float32), ((0, 0), (0, Hp - HIDDEN)))
    b2p = jnp.pad(b2.reshape(1, HIDDEN).astype(jnp.float32), ((0, 0), (0, Hp - HIDDEN)))
    b3s = b3.reshape((1,)).astype(jnp.float32)        # scalar bias -> SMEM

    # Explicit VMEM budget: double-buffered x stream + resident weights + out.
    itm = jnp.dtype(compute_dtype).itemsize
    vmem_need = (2 * bt * Fp * itm                    # x (double-buffered)
                 + 2 * (Fp * Hp + Hp * Hp + Hp) * itm  # w1, w2, w3
                 + 2 * 2 * Hp * 4                     # b1, b2
                 + 2 * bt * 4)                        # output rows
    vmem_limit = int(min(max(2 * vmem_need, 16 * 2**20), 48 * 2**20))  # safe on v7x

    out = pl.pallas_call(
        _mlp_kernel,
        out_shape=jax.ShapeDtypeStruct((num_tiles, bt), jnp.float32),
        grid_spec=pltpu.PrefetchScalarGridSpec(
            num_scalar_prefetch=0,
            grid=(num_tiles,),
            in_specs=[
                # Only x streams; if the DMA is still exposed at very small F,
                # pipeline_mode=pl.Buffered(3) on this spec hides more latency.
                pl.BlockSpec((bt, Fp), lambda i: (i, 0)),
                pl.BlockSpec((Fp, Hp), lambda i: (0, 0)),   # w1 (resident)
                pl.BlockSpec((1, Hp), lambda i: (0, 0)),    # b1
                pl.BlockSpec((Hp, Hp), lambda i: (0, 0)),   # w2
                pl.BlockSpec((1, Hp), lambda i: (0, 0)),    # b2
                pl.BlockSpec((1, Hp), lambda i: (0, 0)),    # w3 row
                pl.BlockSpec(memory_space=pltpu.MemorySpace.SMEM),  # b3 scalar
            ],
            out_specs=pl.BlockSpec((1, bt), lambda i: (i, 0)),
        ),
        compiler_params=pltpu.CompilerParams(
            dimension_semantics=("parallel",),   # megacore split on v7x
            vmem_limit_bytes=vmem_limit,
        ),
    )(xp, w1p, b1p, w2p, b2p, w3p, b3s)

    return out.reshape(B_pad, 1)[:B]


def init_bcc_mlp_params(key, num_features):
    """Deterministic init mirroring nn.Linear default (uniform +-1/sqrt(fan_in))."""
    def linear(key, fan_in, fan_out):
        kw, kb = jax.random.split(key)
        bound = 1.0 / jnp.sqrt(float(fan_in))
        w = jax.random.uniform(kw, (fan_in, fan_out), jnp.float32, -bound, bound)
        b = jax.random.uniform(kb, (1, fan_out), jnp.float32, -bound, bound)
        return w, b

    k1, k2, k3 = jax.random.split(key, 3)
    w1, b1 = linear(k1, num_features, HIDDEN)
    w2, b2 = linear(k2, HIDDEN, HIDDEN)
    w3, b3 = linear(k3, HIDDEN, 1)
    return (w1, b1, w2, b2, w3, b3)


def get_weight_reg_loss(params):
    # Mean absolute value over all parameters (same as torch.cat(...).abs().mean()).
    # Tiny global reduction; kept in plain JAX glue.
    flat = jnp.concatenate([p.reshape(-1) for p in params])
    return jnp.mean(jnp.abs(flat))


if __name__ == "__main__":
    key = jax.random.PRNGKey(0)
    kx, kp = jax.random.split(key)

    num_features = 32
    batch = 8  # small demo batch; wrapper pads to the 128-rounded tile

    x = jax.random.normal(kx, (batch, num_features), dtype=jnp.float32)
    params = init_bcc_mlp_params(kp, num_features)

    # Pure-JAX reference of the same forward pass.
    w1, b1, w2, b2, w3, b3 = params
    ref = jnp.maximum(x @ w1 + b1, 0.0)
    ref = jnp.maximum(ref @ w2 + b2, 0.0)
    ref = ref @ w3 + b3

    # f32 path: bit-accurate vs. the reference.
    y32 = bcc_mlp_forward(x, params, compute_dtype=jnp.float32)
    jax.block_until_ready(y32)
    assert y32.shape == (batch, 1)
    assert jnp.allclose(y32, ref, atol=1e-5, rtol=1e-5), "f32 mismatch vs reference"

    # bf16 path (default): halves the HBM-bound x stream; f32 accumulation.
    y16 = bcc_mlp_forward(x, params)
    jax.block_until_ready(y16)
    assert y16.shape == (batch, 1)
    assert jnp.allclose(y16, ref, atol=5e-2, rtol=5e-2), "bf16 mismatch vs reference"

    _ = jax.block_until_ready(get_weight_reg_loss(params))

    print("KERNEL_OK")
</pallas_src>

<mosaic_0001>
module attributes {stable_mosaic.version = 11 : i64} {
  func.func @_mlp_kernel(%arg0: i32, %arg1: memref<128x128xf32, #tpu.memory_space<vmem>>, %arg2: memref<128x128xf32, #tpu.memory_space<vmem>>, %arg3: memref<1x128xf32, #tpu.memory_space<vmem>>, %arg4: memref<128x128xf32, #tpu.memory_space<vmem>>, %arg5: memref<1x128xf32, #tpu.memory_space<vmem>>, %arg6: memref<1x128xf32, #tpu.memory_space<vmem>>, %arg7: memref<1xf32, #tpu.memory_space<smem>>, %arg8: memref<1x128xf32, #tpu.memory_space<vmem>>) attributes {dimension_semantics = [#tpu.dimension_semantics<parallel>], iteration_bounds = array<i64: 1>, scalar_prefetch = 0 : i64, scratch_operands = 0 : i64, tpu.core_type = #tpu.core_type<tc>, window_params = [{transform_indices = @transform_0, window_bounds = array<i64: 128, 128>}, {pipeline_mode = #tpu.pipeline_mode<synchronous>, transform_indices = @transform_1, window_bounds = array<i64: 128, 128>}, {pipeline_mode = #tpu.pipeline_mode<synchronous>, transform_indices = @transform_2, window_bounds = array<i64: 1, 128>}, {pipeline_mode = #tpu.pipeline_mode<synchronous>, transform_indices = @transform_3, window_bounds = array<i64: 128, 128>}, {pipeline_mode = #tpu.pipeline_mode<synchronous>, transform_indices = @transform_4, window_bounds = array<i64: 1, 128>}, {pipeline_mode = #tpu.pipeline_mode<synchronous>, transform_indices = @transform_5, window_bounds = array<i64: 1, 128>}, {transform_indices = @transform_6, window_bounds = array<i64: 1>}, {transform_indices = @transform_7, window_bounds = array<i64: 1, 128>}]} {
    %c0 = arith.constant 0 : index
    %c0_0 = arith.constant 0 : index
    %0 = vector.load %arg1[%c0, %c0_0] : memref<128x128xf32, #tpu.memory_space<vmem>>, vector<128x128xf32>
    %c0_1 = arith.constant 0 : index
    %c0_2 = arith.constant 0 : index
    %1 = vector.load %arg2[%c0_1, %c0_2] : memref<128x128xf32, #tpu.memory_space<vmem>>, vector<128x128xf32>
    %cst = arith.constant dense<0.000000e+00> : vector<128x128xf32>
    %2 = tpu.matmul %0, %1, %cst {dimension_numbers = #tpu.dot_dimension_numbers<[1], [0], [0], [1], [0, 0, 1, 1], [], []>} : vector<128x128xf32>, vector<128x128xf32>, vector<128x128xf32> -> vector<128x128xf32>
    %c0_3 = arith.constant 0 : index
    %c0_4 = arith.constant 0 : index
    %3 = vector.load %arg3[%c0_3, %c0_4] : memref<1x128xf32, #tpu.memory_space<vmem>>, vector<1x128xf32>
    %4 = vector.broadcast %3 : vector<1x128xf32> to vector<128x128xf32>
    %5 = arith.addf %2, %4 : vector<128x128xf32>
    %cst_5 = arith.constant 0.000000e+00 : f32
    %6 = vector.broadcast %cst_5 : f32 to vector<128x128xf32>
    %7 = arith.maximumf %5, %6 : vector<128x128xf32>
    %c0_6 = arith.constant 0 : index
    %c0_7 = arith.constant 0 : index
    %8 = vector.load %arg4[%c0_6, %c0_7] : memref<128x128xf32, #tpu.memory_space<vmem>>, vector<128x128xf32>
    %cst_8 = arith.constant dense<0.000000e+00> : vector<128x128xf32>
    %9 = tpu.matmul %7, %8, %cst_8 {dimension_numbers = #tpu.dot_dimension_numbers<[1], [0], [0], [1], [0, 0, 1, 1], [], []>} : vector<128x128xf32>, vector<128x128xf32>, vector<128x128xf32> -> vector<128x128xf32>
    %c0_9 = arith.constant 0 : index
    %c0_10 = arith.constant 0 : index
    %10 = vector.load %arg5[%c0_9, %c0_10] : memref<1x128xf32, #tpu.memory_space<vmem>>, vector<1x128xf32>
    %11 = vector.broadcast %10 : vector<1x128xf32> to vector<128x128xf32>
    %12 = arith.addf %9, %11 : vector<128x128xf32>
    %cst_11 = arith.constant 0.000000e+00 : f32
    %13 = vector.broadcast %cst_11 : f32 to vector<128x128xf32>
    %14 = arith.maximumf %12, %13 : vector<128x128xf32>
    %c0_12 = arith.constant 0 : index
    %c0_13 = arith.constant 0 : index
    %15 = vector.load %arg6[%c0_12, %c0_13] : memref<1x128xf32, #tpu.memory_space<vmem>>, vector<1x128xf32>
    %16 = vector.broadcast %15 : vector<1x128xf32> to vector<128x128xf32>
    %17 = arith.mulf %14, %16 : vector<128x128xf32>
    %cst_14 = arith.constant dense<0.000000e+00> : vector<128xf32>
    %18 = vector.multi_reduction <add>, %17, %cst_14 [1] : vector<128x128xf32> to vector<128xf32>
    %c0_15 = arith.constant 0 : index
    %19 = memref.load %arg7[%c0_15] : memref<1xf32, #tpu.memory_space<smem>>
    %20 = vector.broadcast %19 : f32 to vector<128xf32>
    %21 = arith.addf %18, %20 : vector<128xf32>
    %22 = vector.shape_cast %21 : vector<128xf32> to vector<1x128xf32>
    %c0_16 = arith.constant 0 : index
    %c0_17 = arith.constant 0 : index
    %23 = vector.load %arg8[%c0_16, %c0_17] : memref<1x128xf32, #tpu.memory_space<vmem>>, vector<1x128xf32>
    tpu.vector_store %arg8[%c0_16, %c0_17], %22 {strides = array<i32>} : memref<1x128xf32, #tpu.memory_space<vmem>>, vector<1x128xf32>,
    return
  }
  func.func @transform_0(%arg0: i32) -> (i32, i32) {
    %c0_i32 = arith.constant 0 : i32
    %c0_i32_0 = arith.constant 0 : i32
    return %arg0, %c0_i32 : i32, i32
  }
  func.func @transform_1(%arg0: i32) -> (i32, i32) {
    %c0_i32 = arith.constant 0 : i32
    %c0_i32_0 = arith.constant 0 : i32
    %c0_i32_1 = arith.constant 0 : i32
    return %c0_i32, %c0_i32_0 : i32, i32
  }
  func.func @transform_2(%arg0: i32) -> (i32, i32) {
    %c0_i32 = arith.constant 0 : i32
    %c0_i32_0 = arith.constant 0 : i32
    %c0_i32_1 = arith.constant 0 : i32
    return %c0_i32, %c0_i32_0 : i32, i32
  }
  func.func @transform_3(%arg0: i32) -> (i32, i32) {
    %c0_i32 = arith.constant 0 : i32
    %c0_i32_0 = arith.constant 0 : i32
    %c0_i32_1 = arith.constant 0 : i32
    return %c0_i32, %c0_i32_0 : i32, i32
  }
  func.func @transform_4(%arg0: i32) -> (i32, i32) {
    %c0_i32 = arith.constant 0 : i32
    %c0_i32_0 = arith.constant 0 : i32
    %c0_i32_1 = arith.constant 0 : i32
    return %c0_i32, %c0_i32_0 : i32, i32
  }
  func.func @transform_5(%arg0: i32) -> (i32, i32) {
    %c0_i32 = arith.constant 0 : i32
    %c0_i32_0 = arith.constant 0 : i32
    %c0_i32_1 = arith.constant 0 : i32
    return %c0_i32, %c0_i32_0 : i32, i32
  }
  func.func @transform_6(%arg0: i32) -> i32 {
    %c0_i32 = arith.constant 0 : i32
    %c0_i32_0 = arith.constant 0 : i32
    return %c0_i32 : i32
  }
  func.func @transform_7(%arg0: i32) -> (i32, i32) {
    %c0_i32 = arith.constant 0 : i32
    %c0_i32_0 = arith.constant 0 : i32
    return %arg0, %c0_i32 : i32, i32
  }
}

</mosaic_0001>

<bundles_post_ra>
// kernel: bcc_mlp_forward.1
= control target key start
LH: loop header
LB: loop body
LE: loop exit
PB: predicated region body
PF: predicated region fallthrough
CT: control target
= control target key end

     0   :  { %vm511_vm0 = vcmask 130112   ;;  %vm518_vm1 = vcmask 195712   ;;  %vm525_vm2 = vcmask 261312   ;;  %vm532_vm3 = vcmask 326912   ;;  %s1150_s1 = inlined_call_operand.vmem [shape: f32[128,128], index: 1, kind: input, shape index: {}]   ;;  %s1151_s0 = inlined_call_operand.vmem [shape: f32[128,128], index: 0, kind: input, shape index: {}]   ;;  %s1152_s3 = inlined_call_operand.vmem [shape: f32[128,128], index: 3, kind: input, shape index: {}]   ;;  %s1153_s2 = inlined_call_operand.vmem [shape: f32[1,128], index: 2, kind: input, shape index: {}]   ;;  %s1154_s4 = inlined_call_operand.vmem [shape: f32[1,128], index: 4, kind: input, shape index: {}]   ;;  %s1155_s5 = inlined_call_operand.vmem [shape: f32[1,128], index: 5, kind: input, shape index: {}]   ;;  %s1156_s6 = inlined_call_operand.<no memory space> [shape: f32[1], index: 6, kind: input, shape index: {}]   ;;  %s1157_s7 = inlined_call_operand.vmem [shape: f32[1,128], index: 7, kind: output, shape index: {}]  }
   0x1   :  { %v43_v0 = vld [vmem:[%s1150_s1] sm:$0xff]  ;;  %v44_v1 = vld [vmem:[%s1150_s1 + $0x8] sm:$0xff]  ;;  %v45_v2 = vld [vmem:[%s1150_s1 + $0x10] sm:$0xff]  ;;  %vm539_vm4 = vcmask 392512   ;;  %vm546_vm5 = vcmask 458112   ;;  %vm553_vm6 = vcmask 523712  }
   0x2   :  { %v796_v3 = vpack.c.bf16 %v44_v1, %v43_v0  ;;  %v46_v4 = vld [vmem:[%s1150_s1 + $0x18] sm:$0xff]  ;;  %v47_v6 = vld [vmem:[%s1150_s1 + $0x20] sm:$0xff]  ;;  %v48_v7 = vld [vmem:[%s1150_s1 + $0x28] sm:$0xff]  ;;  %vm560_vm7 = vcmask 589312   ;;  %vm567_vm8 = vcmask 654912   ;;  %vm574_vm9 = vcmask 720512  }
   0x3   :  { %v800_v5 = vpack.c.bf16 %v46_v4, %v45_v2  ;;  %v804_v8 = vpack.c.bf16 %v48_v7, %v47_v6  ;;  %v27_v9 = vld [vmem:[%s1151_s0] sm:$0xff]  ;;  %v49_v10 = vld [vmem:[%s1150_s1 + $0x30] sm:$0xff]  ;;  %v50_v11 = vld [vmem:[%s1150_s1 + $0x38] sm:$0xff]  ;;  %vm581_vm10 = vcmask 786112   ;;  %vm588_vm11 = vcmask 851712  }
   0x4   :  { %797 = vmatprep.subr.bf16.mxu0 %v796_v3  ;;  %716 = vmatprep.mubr.f32.mxu0 %v27_v9  ;;  %v808_v12 = vpack.c.bf16 %v50_v11, %v49_v10  ;;  %v51_v13 = vld [vmem:[%s1150_s1 + $0x40] sm:$0xff]  ;;  %v52_v14 = vld [vmem:[%s1150_s1 + $0x48] sm:$0xff]  ;;  %v229_v17 = vld [vmem:[%s1152_s3 + $0x10] sm:$0xff]  ;;  %vm595_vm12 = vcmask 917312   ;;  %vm602_vm13 = vcmask 982912   ;;  %vm609_vm14 = vcmask 1048512  }
   0x5   :  { %799 = vmatpush3.bf16.msra.mxu0 %v796_v3  ;;  %v227_v15 = vld [vmem:[%s1152_s3] sm:$0xff]  ;;  %v228_v16 = vld [vmem:[%s1152_s3 + $0x8] sm:$0xff]  ;;  %v230_v18 = vld [vmem:[%s1152_s3 + $0x18] sm:$0xff]  ;;  %v812_v21 = vpack.c.bf16 %v52_v14, %v51_v13 }
   0x6   :  { %801 = vmatprep.subr.bf16.mxu0 %v800_v5  ;;  %v828_v19 = vpack.c.bf16 %v228_v16, %v227_v15  ;;  %v832_v20 = vpack.c.bf16 %v230_v18, %v229_v17  ;;  %v231_v22 = vld [vmem:[%s1152_s3 + $0x20] sm:$0xff]  ;;  %v232_v23 = vld [vmem:[%s1152_s3 + $0x28] sm:$0xff]  ;;  %v53_v24 = vld [vmem:[%s1150_s1 + $0x50] sm:$0xff] }
   0x7   :  { %v54_v25 = vld [vmem:[%s1150_s1 + $0x58] sm:$0xff]  ;;  %v836_v26 = vpack.c.bf16 %v232_v23, %v231_v22  ;;  %v233_v28 = vld [vmem:[%s1152_s3 + $0x30] sm:$0xff]  ;;  %v55_v30 = vld [vmem:[%s1150_s1 + $0x60] sm:$0xff] }
   0x8   :  { %829 = vmatprep.subr.bf16.mxu1 %v828_v19  ;;  %v816_v27 = vpack.c.bf16 %v54_v25, %v53_v24  ;;  %v234_v29 = vld [vmem:[%s1152_s3 + $0x38] sm:$0xff]  ;;  %v56_v31 = vld [vmem:[%s1150_s1 + $0x68] sm:$0xff]  ;;  %v235_v34 = vld [vmem:[%s1152_s3 + $0x40] sm:$0xff] }
   0x9   :  { %803 = vmatpush3.bf16.msra.mxu0 %v800_v5  ;;  %831 = vmatpush3.bf16.msra.mxu1 %v828_v19  ;;  %v840_v32 = vpack.c.bf16 %v234_v29, %v233_v28  ;;  %v820_v33 = vpack.c.bf16 %v56_v31, %v55_v30  ;;  %v236_v35 = vld [vmem:[%s1152_s3 + $0x48] sm:$0xff]  ;;  %v57_v36 = vld [vmem:[%s1150_s1 + $0x70] sm:$0xff]  ;;  %v58_v37 = vld [vmem:[%s1150_s1 + $0x78] sm:$0xff] }
   0xa   :  { %805 = vmatprep.subr.bf16.mxu0 %v804_v8  ;;  %833 = vmatprep.subr.bf16.mxu1 %v832_v20  ;;  %v844_v38 = vpack.c.bf16 %v236_v35, %v235_v34  ;;  %v824_v39 = vpack.c.bf16 %v58_v37, %v57_v36  ;;  %v237_v40 = vld [vmem:[%s1152_s3 + $0x50] sm:$0xff]  ;;  %v238_v41 = vld [vmem:[%s1152_s3 + $0x58] sm:$0xff]  ;;  %v239_v43 = vld [vmem:[%s1152_s3 + $0x60] sm:$0xff] }
   0xb   :  { %v848_v42 = vpack.c.bf16 %v238_v41, %v237_v40  ;;  %v240_v44 = vld [vmem:[%s1152_s3 + $0x68] sm:$0xff]  ;;  %v29_v47 = vld [vmem:[%s1151_s0 + $0x10] sm:$0xff]  ;;  %v30_v48 = vld [vmem:[%s1151_s0 + $0x18] sm:$0xff] }
   0xc   :  { %v28_v45 = vld [vmem:[%s1151_s0 + $0x8] sm:$0xff]  ;;  %v852_v46 = vpack.c.bf16 %v240_v44, %v239_v43  ;;  %v31_v49 = vld [vmem:[%s1151_s0 + $0x20] sm:$0xff]  ;;  %v33_v51 = vld [vmem:[%s1151_s0 + $0x30] sm:$0xff] }
   0xd   :  { %807 = vmatpush3.bf16.msra.mxu0 %v804_v8  ;;  %835 = vmatpush3.bf16.msra.mxu1 %v832_v20  ;;  %v32_v50 = vld [vmem:[%s1151_s0 + $0x28] sm:$0xff]  ;;  %v34_v52 = vld [vmem:[%s1151_s0 + $0x38] sm:$0xff]  ;;  %v35_v53 = vld [vmem:[%s1151_s0 + $0x40] sm:$0xff] }
   0xe   :  { %809 = vmatprep.subr.bf16.mxu0 %v808_v12  ;;  %837 = vmatprep.subr.bf16.mxu1 %v836_v26  ;;  %v36_v54 = vld [vmem:[%s1151_s0 + $0x48] sm:$0xff]  ;;  %v37_v55 = vld [vmem:[%s1151_s0 + $0x50] sm:$0xff]  ;;  %v38_v56 = vld [vmem:[%s1151_s0 + $0x58] sm:$0xff] }
   0xf   :  { %v39_v57 = vld [vmem:[%s1151_s0 + $0x60] sm:$0xff]  ;;  %v40_v58 = vld [vmem:[%s1151_s0 + $0x68] sm:$0xff]  ;;  %v41_v59 = vld [vmem:[%s1151_s0 + $0x70] sm:$0xff] }
  0x10   :  { %v42_v60 = vld [vmem:[%s1151_s0 + $0x78] sm:$0xff]  ;;  %v241_v61 = vld [vmem:[%s1152_s3 + $0x70] sm:$0xff]  ;;  %v617_v0 = vld [vmem:[%s1153_s2] ss:$0 sm:$0xff] }
  0x11   :  { %811 = vmatpush3.bf16.msra.mxu0 %v808_v12  ;;  %839 = vmatpush3.bf16.msra.mxu1 %v836_v26  ;;  %v242_v62 = vld [vmem:[%s1152_s3 + $0x78] sm:$0xff] }
  0x12   :  { %813 = vmatprep.subr.bf16.mxu0 %v812_v21  ;;  %841 = vmatprep.subr.bf16.mxu1 %v840_v32  ;;  %v856_v63 = vpack.c.bf16 %v242_v62, %v241_v61 }
  0x15   :  { %815 = vmatpush3.bf16.msra.mxu0 %v812_v21  ;;  %843 = vmatpush3.bf16.msra.mxu1 %v840_v32 }
  0x16   :  { %817 = vmatprep.subr.bf16.mxu0 %v816_v27  ;;  %845 = vmatprep.subr.bf16.mxu1 %v844_v38 }
  0x19   :  { %819 = vmatpush3.bf16.msra.mxu0 %v816_v27  ;;  %847 = vmatpush3.bf16.msra.mxu1 %v844_v38 }
  0x1a   :  { %821 = vmatprep.subr.bf16.mxu0 %v820_v33  ;;  %849 = vmatprep.subr.bf16.mxu1 %v848_v42 }
  0x1d   :  { %823 = vmatpush3.bf16.msra.mxu0 %v820_v33  ;;  %851 = vmatpush3.bf16.msra.mxu1 %v848_v42 }
  0x1e   :  { %825 = vmatprep.subr.bf16.mxu0 %v824_v39  ;;  %853 = vmatprep.subr.bf16.mxu1 %v852_v46 }
  0x21   :  { %827 = vmatpush3.bf16.msra.mxu0 %v824_v39  ;;  %855 = vmatpush3.bf16.msra.mxu1 %v852_v46 }
  0x22   :  { %857 = vmatprep.subr.bf16.mxu1 %v856_v63 }
  0x24   :  { %717 = vmatmul.mubr.f32.vlgmr.msra.gmra.mrb[0].mxu0 %v28_v45 }
  0x25   :  { %719 = vmatprep.mubr.f32.mxu0 %v29_v47  ;;  %859 = vmatpush3.bf16.msra.mxu1 %v856_v63 }
  0x28   :  { %720 = vmatmul.mubr.f32.gmra.mrb[2].mxu0 %v30_v48 }
  0x29   :  { %722 = vmatprep.mubr.f32.mxu0 %v31_v49  ;;  %v1050_v49 = vld [vmem:[%s1154_s4] ss:$0 sm:$0xff] }
  0x2c   :  { %723 = vmatmul.mubr.f32.gmra.mrb[4].mxu0 %v32_v50 }
  0x2d   :  { %725 = vmatprep.mubr.f32.mxu0 %v33_v51 }
  0x30   :  { %726 = vmatmul.mubr.f32.gmra.mrb[6].mxu0 %v34_v52 }
  0x31   :  { %728 = vmatprep.mubr.f32.mxu0 %v35_v53 }
  0x34   :  { %729 = vmatmul.mubr.f32.gmra.mrb[8].mxu0 %v36_v54  ;;  %v1057_v54 = vld [vmem:[%s1155_s5] ss:$0 sm:$0xff] }
  0x35   :  { %731 = vmatprep.mubr.f32.mxu0 %v37_v55 }
  0x38   :  { %732 = vmatmul.mubr.f32.gmra.mrb[10].mxu0 %v38_v56 }
  0x39   :  { %734 = vmatprep.mubr.f32.mxu0 %v39_v57 }
  0x3c   :  { %735 = vmatmul.mubr.f32.gmra.mrb[12].mxu0 %v40_v58 }
  0x3d   :  { %737 = vmatprep.mubr.f32.mxu0 %v41_v59 }
  0x40   :  { %738 = vmatmul.mubr.f32.gmra.mrb[14].mxu0 %v42_v60 }
  0xf7   :  { %v718_v1 = vpop.f32.mrb[0].mxu0 }
  0xf8   :  { %v138_v2 = vadd.f32 %v718_v1, %v617_v0  ;;  %v132_v3 = vpop.f32.mrb[1].mxu0 }
  0xf9   :  { %v133_v4 = vadd.f32 %v617_v0, %v132_v3 }
  0xfa   :  { %v212_v7 = vmax.f32 %v138_v2, 0.0 }
  0xfb   :  { %v721_v5 = vpop.f32.mrb[2].mxu0  ;;  %v211_v6 = vmax.f32 %v133_v4, 0.0 }
  0xfc   :  { %v148_v8 = vadd.f32 %v721_v5, %v617_v0  ;;  %v142_v9 = vpop.f32.mrb[3].mxu0 }
  0xfd   :  { %v143_v10 = vadd.f32 %v617_v0, %v142_v9  ;;  %772 = vmatprep.mubr.f32.mxu1 %v211_v6 }
  0xfe   :  { %773 = vmatmul.mubr.f32.vlgmr.msra.gmra.mrb[0].mxu1 %v212_v7  ;;  %v214_v13 = vmax.f32 %v148_v8, 0.0 }
  0xff   :  { %v213_v11 = vmax.f32 %v143_v10, 0.0  ;;  %v724_v12 = vpop.f32.mrb[4].mxu0 }
 0x100   :  { %v158_v14 = vadd.f32 %v724_v12, %v617_v0  ;;  %v152_v15 = vpop.f32.mrb[5].mxu0 }
 0x101   :  { %v153_v16 = vadd.f32 %v617_v0, %v152_v15  ;;  %775 = vmatprep.mubr.f32.mxu1 %v213_v11 }
 0x102   :  { %v216_v17 = vmax.f32 %v158_v14, 0.0  ;;  %776 = vmatmul.mubr.f32.gmra.mrb[2].mxu1 %v214_v13 }
 0x103   :  { %v215_v18 = vmax.f32 %v153_v16, 0.0  ;;  %v727_v19 = vpop.f32.mrb[6].mxu0 }
 0x104   :  { %v168_v20 = vadd.f32 %v727_v19, %v617_v0  ;;  %v162_v21 = vpop.f32.mrb[7].mxu0 }
 0x105   :  { %v163_v22 = vadd.f32 %v617_v0, %v162_v21  ;;  %778 = vmatprep.mubr.f32.mxu1 %v215_v18 }
 0x106   :  { %v218_v23 = vmax.f32 %v168_v20, 0.0  ;;  %779 = vmatmul.mubr.f32.gmra.mrb[4].mxu1 %v216_v17 }
 0x107   :  { %v217_v24 = vmax.f32 %v163_v22, 0.0  ;;  %v730_v25 = vpop.f32.mrb[8].mxu0 }
 0x108   :  { %v178_v26 = vadd.f32 %v730_v25, %v617_v0  ;;  %v172_v27 = vpop.f32.mrb[9].mxu0 }
 0x109   :  { %v173_v28 = vadd.f32 %v617_v0, %v172_v27  ;;  %781 = vmatprep.mubr.f32.mxu1 %v217_v24 }
 0x10a   :  { %v220_v29 = vmax.f32 %v178_v26, 0.0  ;;  %782 = vmatmul.mubr.f32.gmra.mrb[6].mxu1 %v218_v23 }
 0x10b   :  { %v219_v30 = vmax.f32 %v173_v28, 0.0  ;;  %v733_v31 = vpop.f32.mrb[10].mxu0 }
 0x10c   :  { %v188_v32 = vadd.f32 %v733_v31, %v617_v0  ;;  %v182_v33 = vpop.f32.mrb[11].mxu0 }
 0x10d   :  { %v183_v34 = vadd.f32 %v617_v0, %v182_v33  ;;  %784 = vmatprep.mubr.f32.mxu1 %v219_v30 }
 0x10e   :  { %v222_v35 = vmax.f32 %v188_v32, 0.0  ;;  %785 = vmatmul.mubr.f32.gmra.mrb[8].mxu1 %v220_v29 }
 0x10f   :  { %v221_v36 = vmax.f32 %v183_v34, 0.0  ;;  %v736_v37 = vpop.f32.mrb[12].mxu0 }
 0x110   :  { %v198_v38 = vadd.f32 %v736_v37, %v617_v0  ;;  %v192_v39 = vpop.f32.mrb[13].mxu0 }
 0x111   :  { %v193_v40 = vadd.f32 %v617_v0, %v192_v39  ;;  %787 = vmatprep.mubr.f32.mxu1 %v221_v36 }
 0x112   :  { %v224_v41 = vmax.f32 %v198_v38, 0.0  ;;  %788 = vmatmul.mubr.f32.gmra.mrb[10].mxu1 %v222_v35 }
 0x113   :  { %v223_v42 = vmax.f32 %v193_v40, 0.0  ;;  %v739_v43 = vpop.f32.mrb[14].mxu0 }
 0x114   :  { %v208_v44 = vadd.f32 %v739_v43, %v617_v0  ;;  %v202_v45 = vpop.f32.mrb[15].mxu0 }
 0x115   :  { %v203_v46 = vadd.f32 %v617_v0, %v202_v45  ;;  %790 = vmatprep.mubr.f32.mxu1 %v223_v42 }
 0x116   :  { %v226_v47 = vmax.f32 %v208_v44, 0.0  ;;  %791 = vmatmul.mubr.f32.gmra.mrb[12].mxu1 %v224_v41 }
 0x117   :  { %v225_v48 = vmax.f32 %v203_v46, 0.0 }
 0x119   :  { %793 = vmatprep.mubr.f32.mxu1 %v225_v48 }
 0x11a   :  { %794 = vmatmul.mubr.f32.gmra.mrb[14].mxu1 %v226_v47 }
 0x1d1   :  { %v774_v50 = vpop.f32.mrb[0].mxu1 }
 0x1d2   :  { %v322_v51 = vadd.f32 %v774_v50, %v1050_v49  ;;  %v316_v52 = vpop.f32.mrb[1].mxu1 }
 0x1d3   :  { %v317_v53 = vadd.f32 %v1050_v49, %v316_v52  ;;  %v500_v52 = vlaneseq }
 0x1d4   :  { %v396_v55 = vmax.f32 %v322_v51, 0.0 }
 0x1d5   :  { %v777_v56 = vpop.f32.mrb[2].mxu1  ;;  %v395_v57 = vmax.f32 %v317_v53, 0.0  ;;  %v1089_v53 = vand.u32 127, %v500_v52 }
 0x1d6   :  { %v332_v58 = vadd.f32 %v777_v56, %v1050_v49  ;;  %v326_v59 = vpop.f32.mrb[3].mxu1  ;;  %v419_v60 = vmul.f32 %v1057_v54, %v396_v55 }
 0x1d7   :  { %v327_v61 = vadd.f32 %v1050_v49, %v326_v59  ;;  %v418_v4 = vmul.f32 %v1057_v54, %v395_v57  ;;  %v506_v56 = vadd.s32 4294967288, %v1089_v53  ;;  %v1097_v57 = vstv %s1156_s6 }
 0x1d8   :  { %v398_v62 = vmax.f32 %v332_v58, 0.0  ;;  %436 = vadd.xlane.f32.xlu0 %v419_v60  ;;  %v513_v58 = vadd.s32 4294967280, %v1089_v53  ;;  %v520_v59 = vadd.s32 4294967272, %v1089_v53 }
 0x1d9   :  { %v780_v63 = vpop.f32.mrb[4].mxu1  ;;  %v397_v0 = vmax.f32 %v327_v61, 0.0 }
 0x1da   :  { %v342_v1 = vadd.f32 %v780_v63, %v1050_v49  ;;  %v336_v2 = vpop.f32.mrb[5].mxu1  ;;  %v421_v3 = vmul.f32 %v1057_v54, %v398_v62  ;;  %v527_v62 = vadd.s32 4294967264, %v1089_v53 }
 0x1db   :  { %v337_v5 = vadd.f32 %v1050_v49, %v336_v2  ;;  %v420_v11 = vmul.f32 %v1057_v54, %v397_v0  ;;  %v534_v2 = vadd.s32 4294967256, %v1089_v53 }
 0x1dc   :  { %440 = vadd.xlane.f32.xlu1 %v421_v3  ;;  %434 = vadd.xlane.f32.xlu0 %v418_v4  ;;  %v400_v8 = vmax.f32 %v342_v1, 0.0  ;;  %v541_v4 = vadd.s32 4294967248, %v1089_v53 }
 0x1dd   :  { %v399_v6 = vmax.f32 %v337_v5, 0.0  ;;  %v783_v7 = vpop.f32.mrb[6].mxu1 }
 0x1de   :  { %v352_v9 = vadd.f32 %v783_v7, %v1050_v49  ;;  %v346_v10 = vpop.f32.mrb[7].mxu1  ;;  %v423_v19 = vmul.f32 %v1057_v54, %v400_v8 }
 0x1df   :  { %v347_v12 = vadd.f32 %v1050_v49, %v346_v10  ;;  %v422_v13 = vmul.f32 %v1057_v54, %v399_v6 }
 0x1e0   :  { %438 = vadd.xlane.f32.xlu1 %v420_v11  ;;  %v402_v16 = vmax.f32 %v352_v9, 0.0 }
 0x1e1   :  { %v401_v14 = vmax.f32 %v347_v12, 0.0  ;;  %v786_v15 = vpop.f32.mrb[8].mxu1  ;;  %442 = vadd.xlane.f32.xlu0 %v422_v13 }
 0x1e2   :  { %v362_v17 = vadd.f32 %v786_v15, %v1050_v49  ;;  %v356_v18 = vpop.f32.mrb[9].mxu1  ;;  %v425_v27 = vmul.f32 %v1057_v54, %v402_v16 }
 0x1e3   :  { %v357_v20 = vadd.f32 %v1050_v49, %v356_v18  ;;  %v424_v21 = vmul.f32 %v1057_v54, %v401_v14 }
 0x1e4   :  { %444 = vadd.xlane.f32.xlu1 %v423_v19  ;;  %v404_v24 = vmax.f32 %v362_v17, 0.0  ;;  %v548_v17 = vadd.s32 4294967240, %v1089_v53 }
 0x1e5   :  { %v403_v22 = vmax.f32 %v357_v20, 0.0  ;;  %v789_v23 = vpop.f32.mrb[10].mxu1  ;;  %446 = vadd.xlane.f32.xlu0 %v424_v21 }
 0x1e6   :  { %v372_v25 = vadd.f32 %v789_v23, %v1050_v49  ;;  %v366_v26 = vpop.f32.mrb[11].mxu1  ;;  %v427_v35 = vmul.f32 %v1057_v54, %v404_v24 }
 0x1e7   :  { %v367_v28 = vadd.f32 %v1050_v49, %v366_v26  ;;  %v426_v29 = vmul.f32 %v1057_v54, %v403_v22  ;;  %v555_v22 = vadd.s32 4294967232, %v1089_v53 }
 0x1e8   :  { %448 = vadd.xlane.f32.xlu1 %v425_v27  ;;  %v406_v32 = vmax.f32 %v372_v25, 0.0 }
 0x1e9   :  { %v405_v30 = vmax.f32 %v367_v28, 0.0  ;;  %v792_v31 = vpop.f32.mrb[12].mxu1  ;;  %450 = vadd.xlane.f32.xlu0 %v426_v29 }
 0x1ea   :  { %v382_v33 = vadd.f32 %v792_v31, %v1050_v49  ;;  %v376_v34 = vpop.f32.mrb[13].mxu1  ;;  %v429_v43 = vmul.f32 %v1057_v54, %v406_v32  ;;  %v562_v31 = vadd.s32 4294967224, %v1089_v53 }
 0x1eb   :  { %v377_v36 = vadd.f32 %v1050_v49, %v376_v34  ;;  %v428_v37 = vmul.f32 %v1057_v54, %v405_v30 }
 0x1ec   :  { %452 = vadd.xlane.f32.xlu1 %v427_v35  ;;  %v408_v40 = vmax.f32 %v382_v33, 0.0  ;;  %v569_v35 = vadd.s32 4294967216, %v1089_v53 }
 0x1ed   :  { %v407_v38 = vmax.f32 %v377_v36, 0.0  ;;  %v795_v39 = vpop.f32.mrb[14].mxu1  ;;  %454 = vadd.xlane.f32.xlu0 %v428_v37 }
 0x1ee   :  { %v392_v41 = vadd.f32 %v795_v39, %v1050_v49  ;;  %v386_v42 = vpop.f32.mrb[15].mxu1  ;;  %v431_v48 = vmul.f32 %v1057_v54, %v408_v40 }
 0x1ef   :  { %v387_v44 = vadd.f32 %v1050_v49, %v386_v42  ;;  %v430_v45 = vmul.f32 %v1057_v54, %v407_v38  ;;  %v1091_v49 = vshrl.u32 %v500_v52, 7  ;;  %v576_v42 = vadd.s32 4294967208, %v1089_v53 }
 0x1f0   :  { %456 = vadd.xlane.f32.xlu1 %v429_v43  ;;  %v410_v47 = vmax.f32 %v392_v41, 0.0 }
 0x1f1   :  { %v409_v46 = vmax.f32 %v387_v44, 0.0  ;;  %458 = vadd.xlane.f32.xlu0 %v430_v45  ;;  %v509_v0 = vsub.s32 %v506_v56, %v1091_v49  ;;  %v516_v3 = vsub.s32 %v513_v58, %v1091_v49  ;;  %v523_v5 = vsub.s32 %v520_v59, %v1091_v49 }
 0x1f2   :  { %v433_v51 = vmul.f32 %v1057_v54, %v410_v47  ;;  %v530_v9 = vsub.s32 %v527_v62, %v1091_v49  ;;  %v537_v14 = vsub.s32 %v534_v2, %v1091_v49  ;;  %v544_v16 = vsub.s32 %v541_v4, %v1091_v49 }
 0x1f3   :  { %v432_v50 = vmul.f32 %v1057_v54, %v409_v46  ;;  %v504_v54 = vsub.s32 %v1089_v53, %v1091_v49  ;;  %v551_v30 = vsub.s32 %v548_v17, %v1091_v49  ;;  %v558_v34 = vsub.s32 %v555_v22, %v1091_v49 }
 0x1f4   :  { %460 = vadd.xlane.f32.xlu1 %v431_v48  ;;  %v565_v41 = vsub.s32 %v562_v31, %v1091_v49  ;;  %v572_v46 = vsub.s32 %v569_v35, %v1091_v49  ;;  %v583_v47 = vadd.s32 4294967200, %v1089_v53  ;;  %v579_v56 = vsub.s32 %v576_v42, %v1091_v49 }
 0x1f5   :  { %462 = vadd.xlane.f32.xlu0 %v432_v50  ;;  %v590_v58 = vadd.s32 4294967192, %v1089_v53  ;;  %v597_v62 = vadd.s32 4294967184, %v1089_v53 }
 0x1f7   :  { %v593_v4 = vsub.s32 %v590_v58, %v1091_v49 }
 0x1f8   :  { %464 = vadd.xlane.f32.xlu1 %v433_v51 }
 0x265   :  { %v437_v55 = vpop.xlane.xlu0 %436 }
 0x266   :  { %v469_v1 = vadd.f32 %v1097_v57, %v437_v55 }
 0x268   :  { %v510_v12 = vrot.slane %v469_v1, %v509_v0 }
 0x269   :  { %v441_v60 = vpop.xlane.xlu1 %440  ;;  %v435_v61 = vpop.xlane.xlu0 %434 }
 0x26a   :  { %v468_v63 = vadd.f32 %v1097_v57, %v435_v61  ;;  %v471_v6 = vadd.f32 %v1097_v57, %v441_v60  ;;  %v586_v61 = vsub.s32 %v583_v47, %v1091_v49 }
 0x26c   :  { %v505_v7 = vrot.slane %v468_v63, %v504_v54  ;;  %v524_v18 = vrot.slane %v471_v6, %v523_v5  ;;  %v604_v5 = vadd.s32 4294967176, %v1089_v53 }
 0x26d   :  { %v439_v8 = vpop.xlane.xlu1 %438 }
 0x26e   :  { %v470_v10 = vadd.f32 %v1097_v57, %v439_v8  ;;  %v443_v11 = vpop.xlane.xlu0 %442  ;;  %v512_v19 = vsel %vm511_vm0, %v510_v12, %v505_v7 }
 0x26f   :  { %v472_v13 = vadd.f32 %v1097_v57, %v443_v11 }
 0x270   :  { %v517_v15 = vrot.slane %v470_v10, %v516_v3 }
 0x271   :  { %v531_v20 = vrot.slane %v472_v13, %v530_v9  ;;  %v445_v21 = vpop.xlane.xlu1 %444  ;;  %v600_v9 = vsub.s32 %v597_v62, %v1091_v49 }
 0x272   :  { %v519_v23 = vsel %vm518_vm1, %v517_v15, %v512_v19  ;;  %v473_v24 = vadd.f32 %v1097_v57, %v445_v21  ;;  %v447_v25 = vpop.xlane.xlu0 %446  ;;  %v607_v15 = vsub.s32 %v604_v5, %v1091_v49 }
 0x273   :  { %v526_v26 = vsel %vm525_vm2, %v524_v18, %v519_v23  ;;  %v474_v27 = vadd.f32 %v1097_v57, %v447_v25 }
 0x274   :  { %v533_v28 = vsel %vm532_vm3, %v531_v20, %v526_v26  ;;  %v538_v29 = vrot.slane %v473_v24, %v537_v14 }
 0x275   :  { %v545_v32 = vrot.slane %v474_v27, %v544_v16  ;;  %v449_v33 = vpop.xlane.xlu1 %448 }
 0x276   :  { %v540_v36 = vsel %vm539_vm4, %v538_v29, %v533_v28  ;;  %v475_v37 = vadd.f32 %v1097_v57, %v449_v33  ;;  %v451_v38 = vpop.xlane.xlu0 %450 }
 0x277   :  { %v476_v39 = vadd.f32 %v1097_v57, %v451_v38  ;;  %v547_v43 = vsel %vm546_vm5, %v545_v32, %v540_v36 }
 0x278   :  { %v552_v40 = vrot.slane %v475_v37, %v551_v30 }
 0x279   :  { %v559_v44 = vrot.slane %v476_v39, %v558_v34  ;;  %v453_v45 = vpop.xlane.xlu1 %452 }
 0x27a   :  { %v554_v48 = vsel %vm553_vm6, %v552_v40, %v547_v43  ;;  %v477_v50 = vadd.f32 %v1097_v57, %v453_v45  ;;  %v455_v51 = vpop.xlane.xlu0 %454 }
 0x27b   :  { %v478_v52 = vadd.f32 %v1097_v57, %v455_v51  ;;  %v561_v59 = vsel %vm560_vm7, %v559_v44, %v554_v48 }
 0x27c   :  { %v566_v55 = vrot.slane %v477_v50, %v565_v41 }
 0x27d   :  { %v573_v60 = vrot.slane %v478_v52, %v572_v46  ;;  %v457_v54 = vpop.xlane.xlu1 %456 }
 0x27e   :  { %v568_v63 = vsel %vm567_vm8, %v566_v55, %v561_v59  ;;  %v479_v0 = vadd.f32 %v1097_v57, %v457_v54  ;;  %v459_v1 = vpop.xlane.xlu0 %458 }
 0x27f   :  { %v480_v2 = vadd.f32 %v1097_v57, %v459_v1  ;;  %v575_v6 = vsel %vm574_vm9, %v573_v60, %v568_v63 }
 0x280   :  { %v580_v3 = vrot.slane %v479_v0, %v579_v56 }
 0x281   :  { %v587_v7 = vrot.slane %v480_v2, %v586_v61  ;;  %v461_v8 = vpop.xlane.xlu1 %460 }
 0x282   :  { %v582_v10 = vsel %vm581_vm10, %v580_v3, %v575_v6  ;;  %v481_v11 = vadd.f32 %v1097_v57, %v461_v8  ;;  %v463_v12 = vpop.xlane.xlu0 %462 }
 0x283   :  { %v482_v13 = vadd.f32 %v1097_v57, %v463_v12  ;;  %v589_v16 = vsel %vm588_vm11, %v587_v7, %v582_v10 }
 0x284   :  { %v594_v14 = vrot.slane %v481_v11, %v593_v4 }
 0x285   :  { %v601_v17 = vrot.slane %v482_v13, %v600_v9  ;;  %v465_v18 = vpop.xlane.xlu1 %464 }
 0x286   :  { %v596_v53 = vsel %vm595_vm12, %v594_v14, %v589_v16  ;;  %v483_v19 = vadd.f32 %v1097_v57, %v465_v18 }
 0x287   :  { %v603_v21 = vsel %vm602_vm13, %v601_v17, %v596_v53 }
 0x288   :  { %v608_v20 = vrot.slane %v483_v19, %v607_v15 }
 0x28a   :  { %v610_v22 = vsel %vm609_vm14, %v608_v20, %v603_v21 }
 0x28b   :  { %612 = vst [vmem:[%s1157_s7] sm:$0x1] %v610_v22 }

</bundles_post_ra>
